<compile_context>
chip_gen: v7x
topology: tpu7x:2x2x1
jax: 0.10.0
libtpu: 0.0.40
codegen_flags: <defaults>
</compile_context>

<pallas_src>
import jax
import jax.numpy as jnp
from jax.experimental import pallas as pl
from jax.experimental.pallas import tpu as pltpu


def _round_up(x, m):
    return ((x + m - 1) // m) * m


def mlp_kernel(x_ref, w1_ref, b1_ref, w2_ref, b2_ref, w3_ref, b3_ref, o_ref):
    """Whole 3-layer MLP hot path fused into one kernel (per batch tile).

    Weights may be bf16 (MXU native on v6e/v7x); accumulation, bias add,
    tanh and clip are done in f32.
    """
    x = x_ref[...]
    h1 = jnp.tanh(
        jnp.dot(x, w1_ref[...], preferred_element_type=jnp.float32) + b1_ref[...]
    )
    h1 = h1.astype(w2_ref.dtype)
    h2 = jnp.tanh(
        jnp.dot(h1, w2_ref[...], preferred_element_type=jnp.float32) + b2_ref[...]
    )
    h2 = h2.astype(w3_ref.dtype)
    out = jnp.dot(h2, w3_ref[...], preferred_element_type=jnp.float32) + b3_ref[...]
    o_ref[...] = jnp.clip(out, -1.0, 1.0)


def init_params(key, n_inputs, n_actions, hidden=64):
    """Deterministic PyTorch-Linear-style init: U(-1/sqrt(fan_in), 1/sqrt(fan_in)).

    Returned layout: W as [in_features, out_features], b as [1, out_features].
    """
    keys = jax.random.split(key, 6)

    def linear(kw, kb, fan_in, fan_out):
        bound = 1.0 / jnp.sqrt(jnp.float32(fan_in))
        w = jax.random.uniform(kw, (fan_out, fan_in), jnp.float32, -bound, bound)
        b = jax.random.uniform(kb, (fan_out,), jnp.float32, -bound, bound)
        return w.T, b[None, :]

    w1, b1 = linear(keys[0], keys[1], n_inputs, hidden)
    w2, b2 = linear(keys[2], keys[3], hidden, hidden)
    w3, b3 = linear(keys[4], keys[5], hidden, n_actions)
    return (w1, b1, w2, b2, w3, b3)


def prepare_params(params, compute_dtype=jnp.float32):
    """One-time weight prep: zero-pad hidden/output dims to 128 (lane-dense),
    optionally cast weights to bf16.  Biases stay f32 (added post-matmul)."""
    w1, b1, w2, b2, w3, b3 = params
    n_in, hidden = w1.shape
    n_act = w3.shape[1]
    hp = _round_up(hidden, 128)
    n_act_p = _round_up(n_act, 128)

    w1p = jnp.zeros((n_in, hp), jnp.float32).at[:, :hidden].set(w1)
    b1p = jnp.zeros((1, hp), jnp.float32).at[:, :hidden].set(b1)
    w2p = jnp.zeros((hp, hp), jnp.float32).at[:hidden, :hidden].set(w2)
    b2p = jnp.zeros((1, hp), jnp.float32).at[:, :hidden].set(b2)
    w3p = jnp.zeros((hp, n_act_p), jnp.float32).at[:hidden, :n_act].set(w3)
    b3p = jnp.zeros((1, n_act_p), jnp.float32).at[:, :n_act].set(b3)

    w1p = w1p.astype(compute_dtype)
    w2p = w2p.astype(compute_dtype)
    w3p = w3p.astype(compute_dtype)
    return (w1p, b1p, w2p, b2p, w3p, b3p), n_act


def mlp_forward(x, prepared_params, n_actions, *, tb=512):
    """Pallas wrapper. Accepts x of shape [n_inputs] or [batch, n_inputs]."""
    assert tb % 8 == 0
    w1, b1, w2, b2, w3, b3 = prepared_params
    x = jnp.asarray(x, jnp.float32)  # mirrors th.from_numpy(x).float()
    squeeze = False
    if x.ndim == 1:
        x = x[None, :]
        squeeze = True
    B, n_in = x.shape
    n_act_p = w3.shape[1]

    # Adaptive batch tile: big enough to fill the MXU / amortize per-step
    # overhead, but never larger than the (8-aligned) batch itself.
    tb_eff = min(tb, _round_up(B, 8))
    Bp = _round_up(B, tb_eff)
    x = x.astype(w1.dtype)
    if Bp != B:
        # Only the ragged remainder is padded (at most tb_eff - 1 rows).
        x = jnp.pad(x, ((0, Bp - B), (0, 0)))

    out = pl.pallas_call(
        mlp_kernel,
        out_shape=jax.ShapeDtypeStruct((Bp, n_act_p), jnp.float32),
        grid_spec=pltpu.PrefetchScalarGridSpec(
            num_scalar_prefetch=0,
            grid=(Bp // tb_eff,),
            in_specs=[
                pl.BlockSpec((tb_eff, n_in), lambda i: (i, 0)),  # x tile (streamed)
                pl.BlockSpec(w1.shape, lambda i: (0, 0)),        # weights/biases stay
                pl.BlockSpec(b1.shape, lambda i: (0, 0)),        # resident across grid
                pl.BlockSpec(w2.shape, lambda i: (0, 0)),
                pl.BlockSpec(b2.shape, lambda i: (0, 0)),
                pl.BlockSpec(w3.shape, lambda i: (0, 0)),
                pl.BlockSpec(b3.shape, lambda i: (0, 0)),
            ],
            out_specs=pl.BlockSpec((tb_eff, n_act_p), lambda i: (i, 0)),  # lane-dense
        ),
        compiler_params=pltpu.CompilerParams(
            dimension_semantics=("parallel",),  # shard batch tiles across TCs (v7x)
        ),
    )(x, w1, b1, w2, b2, w3, b3)

    out = out[:B, :n_actions]
    if squeeze:
        out = out[0]
    return out


def mlp_reference(x, params):
    """Pure-JAX reference (unpadded, f32) for correctness checks."""
    w1, b1, w2, b2, w3, b3 = params
    x = jnp.asarray(x, jnp.float32)
    h1 = jnp.tanh(x @ w1 + b1[0])
    h2 = jnp.tanh(h1 @ w2 + b2[0])
    return jnp.clip(h2 @ w3 + b3[0], -1.0, 1.0)


if __name__ == "__main__":
    n_inputs, n_actions = 32, 8

    key = jax.random.PRNGKey(0)
    kx1, kx2, kp = jax.random.split(key, 3)
    params = init_params(kp, n_inputs, n_actions)

    # --- small single-tile case, f32 operands (strict check) ---
    x_small = jax.random.normal(kx1, (8, n_inputs), jnp.float32)
    prep_f32, n_act = prepare_params(params, jnp.float32)
    out_small = jax.block_until_ready(mlp_forward(x_small, prep_f32, n_act))
    ref_small = mlp_reference(x_small, params)
    assert out_small.shape == (8, n_actions), out_small.shape
    assert jnp.allclose(out_small, ref_small, atol=1e-5, rtol=1e-5), "f32 mismatch"

    # --- ragged multi-tile batch (exercises batch padding + grid > 1) ---
    x_big = jax.random.normal(kx2, (300, n_inputs), jnp.float32)
    ref_big = mlp_reference(x_big, params)
    out_big = jax.block_until_ready(mlp_forward(x_big, prep_f32, n_act, tb=256))
    assert out_big.shape == (300, n_actions), out_big.shape
    assert jnp.allclose(out_big, ref_big, atol=1e-5, rtol=1e-5), "f32 tiled mismatch"

    # --- bf16 operand path (v6e / v7x MXU-native), looser tolerance ---
    prep_bf16, _ = prepare_params(params, jnp.bfloat16)
    out_bf16 = jax.block_until_ready(mlp_forward(x_big, prep_bf16, n_act, tb=256))
    assert jnp.allclose(out_bf16, ref_big, atol=3e-2, rtol=3e-2), "bf16 mismatch"

    # --- 1-D input path (typical single-observation call of the module) ---
    out_1d = jax.block_until_ready(mlp_forward(x_small[0], prep_f32, n_act))
    assert out_1d.shape == (n_actions,), out_1d.shape
    assert jnp.allclose(out_1d, ref_small[0], atol=1e-5, rtol=1e-5), "1-D mismatch"

    print("KERNEL_OK")
</pallas_src>

<mosaic_0001>
module attributes {stable_mosaic.version = 11 : i64} {
  func.func @mlp_kernel(%arg0: i32, %arg1: memref<8x32xf32, #tpu.memory_space<vmem>>, %arg2: memref<32x128xf32, #tpu.memory_space<vmem>>, %arg3: memref<1x128xf32, #tpu.memory_space<vmem>>, %arg4: memref<128x128xf32, #tpu.memory_space<vmem>>, %arg5: memref<1x128xf32, #tpu.memory_space<vmem>>, %arg6: memref<128x128xf32, #tpu.memory_space<vmem>>, %arg7: memref<1x128xf32, #tpu.memory_space<vmem>>, %arg8: memref<8x128xf32, #tpu.memory_space<vmem>>) attributes {dimension_semantics = [#tpu.dimension_semantics<parallel>], iteration_bounds = array<i64: 1>, scalar_prefetch = 0 : i64, scratch_operands = 0 : i64, tpu.core_type = #tpu.core_type<tc>, window_params = [{transform_indices = @transform_0, window_bounds = array<i64: 8, 32>}, {pipeline_mode = #tpu.pipeline_mode<synchronous>, transform_indices = @transform_1, window_bounds = array<i64: 32, 128>}, {pipeline_mode = #tpu.pipeline_mode<synchronous>, transform_indices = @transform_2, window_bounds = array<i64: 1, 128>}, {pipeline_mode = #tpu.pipeline_mode<synchronous>, transform_indices = @transform_3, window_bounds = array<i64: 128, 128>}, {pipeline_mode = #tpu.pipeline_mode<synchronous>, transform_indices = @transform_4, window_bounds = array<i64: 1, 128>}, {pipeline_mode = #tpu.pipeline_mode<synchronous>, transform_indices = @transform_5, window_bounds = array<i64: 128, 128>}, {pipeline_mode = #tpu.pipeline_mode<synchronous>, transform_indices = @transform_6, window_bounds = array<i64: 1, 128>}, {transform_indices = @transform_7, window_bounds = array<i64: 8, 128>}]} {
    %c0 = arith.constant 0 : index
    %c0_0 = arith.constant 0 : index
    %0 = vector.load %arg1[%c0, %c0_0] : memref<8x32xf32, #tpu.memory_space<vmem>>, vector<8x32xf32>
    %c0_1 = arith.constant 0 : index
    %c0_2 = arith.constant 0 : index
    %1 = vector.load %arg2[%c0_1, %c0_2] : memref<32x128xf32, #tpu.memory_space<vmem>>, vector<32x128xf32>
    %cst = arith.constant dense<0.000000e+00> : vector<8x128xf32>
    %2 = tpu.matmul %0, %1, %cst {dimension_numbers = #tpu.dot_dimension_numbers<[1], [0], [0], [1], [0, 0, 1, 1], [], []>} : vector<8x32xf32>, vector<32x128xf32>, vector<8x128xf32> -> vector<8x128xf32>
    %c0_3 = arith.constant 0 : index
    %c0_4 = arith.constant 0 : index
    %3 = vector.load %arg3[%c0_3, %c0_4] : memref<1x128xf32, #tpu.memory_space<vmem>>, vector<1x128xf32>
    %4 = vector.broadcast %3 : vector<1x128xf32> to vector<8x128xf32>
    %5 = arith.addf %2, %4 : vector<8x128xf32>
    %6 = math.tanh %5 : vector<8x128xf32>
    %c0_5 = arith.constant 0 : index
    %c0_6 = arith.constant 0 : index
    %7 = vector.load %arg4[%c0_5, %c0_6] : memref<128x128xf32, #tpu.memory_space<vmem>>, vector<128x128xf32>
    %cst_7 = arith.constant dense<0.000000e+00> : vector<8x128xf32>
    %8 = tpu.matmul %6, %7, %cst_7 {dimension_numbers = #tpu.dot_dimension_numbers<[1], [0], [0], [1], [0, 0, 1, 1], [], []>} : vector<8x128xf32>, vector<128x128xf32>, vector<8x128xf32> -> vector<8x128xf32>
    %c0_8 = arith.constant 0 : index
    %c0_9 = arith.constant 0 : index
    %9 = vector.load %arg5[%c0_8, %c0_9] : memref<1x128xf32, #tpu.memory_space<vmem>>, vector<1x128xf32>
    %10 = vector.broadcast %9 : vector<1x128xf32> to vector<8x128xf32>
    %11 = arith.addf %8, %10 : vector<8x128xf32>
    %12 = math.tanh %11 : vector<8x128xf32>
    %c0_10 = arith.constant 0 : index
    %c0_11 = arith.constant 0 : index
    %13 = vector.load %arg6[%c0_10, %c0_11] : memref<128x128xf32, #tpu.memory_space<vmem>>, vector<128x128xf32>
    %cst_12 = arith.constant dense<0.000000e+00> : vector<8x128xf32>
    %14 = tpu.matmul %12, %13, %cst_12 {dimension_numbers = #tpu.dot_dimension_numbers<[1], [0], [0], [1], [0, 0, 1, 1], [], []>} : vector<8x128xf32>, vector<128x128xf32>, vector<8x128xf32> -> vector<8x128xf32>
    %c0_13 = arith.constant 0 : index
    %c0_14 = arith.constant 0 : index
    %15 = vector.load %arg7[%c0_13, %c0_14] : memref<1x128xf32, #tpu.memory_space<vmem>>, vector<1x128xf32>
    %16 = vector.broadcast %15 : vector<1x128xf32> to vector<8x128xf32>
    %17 = arith.addf %14, %16 : vector<8x128xf32>
    %cst_15 = arith.constant -1.000000e+00 : f32
    %cst_16 = arith.constant 1.000000e+00 : f32
    %18 = vector.broadcast %cst_15 : f32 to vector<8x128xf32>
    %19 = arith.maximumf %18, %17 : vector<8x128xf32>
    %20 = vector.broadcast %cst_16 : f32 to vector<8x128xf32>
    %21 = arith.minimumf %20, %19 : vector<8x128xf32>
    %c0_17 = arith.constant 0 : index
    %c0_18 = arith.constant 0 : index
    %22 = vector.load %arg8[%c0_17, %c0_18] : memref<8x128xf32, #tpu.memory_space<vmem>>, vector<8x128xf32>
    tpu.vector_store %arg8[%c0_17, %c0_18], %21 {strides = array<i32>} : memref<8x128xf32, #tpu.memory_space<vmem>>, vector<8x128xf32>,
    return
  }
  func.func @transform_0(%arg0: i32) -> (i32, i32) {
    %c0_i32 = arith.constant 0 : i32
    %c0_i32_0 = arith.constant 0 : i32
    return %arg0, %c0_i32 : i32, i32
  }
  func.func @transform_1(%arg0: i32) -> (i32, i32) {
    %c0_i32 = arith.constant 0 : i32
    %c0_i32_0 = arith.constant 0 : i32
    %c0_i32_1 = arith.constant 0 : i32
    return %c0_i32, %c0_i32_0 : i32, i32
  }
  func.func @transform_2(%arg0: i32) -> (i32, i32) {
    %c0_i32 = arith.constant 0 : i32
    %c0_i32_0 = arith.constant 0 : i32
    %c0_i32_1 = arith.constant 0 : i32
    return %c0_i32, %c0_i32_0 : i32, i32
  }
  func.func @transform_3(%arg0: i32) -> (i32, i32) {
    %c0_i32 = arith.constant 0 : i32
    %c0_i32_0 = arith.constant 0 : i32
    %c0_i32_1 = arith.constant 0 : i32
    return %c0_i32, %c0_i32_0 : i32, i32
  }
  func.func @transform_4(%arg0: i32) -> (i32, i32) {
    %c0_i32 = arith.constant 0 : i32
    %c0_i32_0 = arith.constant 0 : i32
    %c0_i32_1 = arith.constant 0 : i32
    return %c0_i32, %c0_i32_0 : i32, i32
  }
  func.func @transform_5(%arg0: i32) -> (i32, i32) {
    %c0_i32 = arith.constant 0 : i32
    %c0_i32_0 = arith.constant 0 : i32
    %c0_i32_1 = arith.constant 0 : i32
    return %c0_i32, %c0_i32_0 : i32, i32
  }
  func.func @transform_6(%arg0: i32) -> (i32, i32) {
    %c0_i32 = arith.constant 0 : i32
    %c0_i32_0 = arith.constant 0 : i32
    %c0_i32_1 = arith.constant 0 : i32
    return %c0_i32, %c0_i32_0 : i32, i32
  }
  func.func @transform_7(%arg0: i32) -> (i32, i32) {
    %c0_i32 = arith.constant 0 : i32
    %c0_i32_0 = arith.constant 0 : i32
    return %arg0, %c0_i32 : i32, i32
  }
}

</mosaic_0001>

<bundles_post_ra>
// kernel: tpu_custom_call.1
= control target key start
LH: loop header
LB: loop body
LE: loop exit
PB: predicated region body
PF: predicated region fallthrough
CT: control target
= control target key end

     0   :  { %12 = vsyncpa [#allocation3], 0  ;;  %s834_s0 = inlined_call_operand.hbm [shape: f32[8,32], index: 0, kind: input, shape index: {}]   ;;  %s835_s1 = inlined_call_operand.hbm [shape: f32[32,128], index: 1, kind: input, shape index: {}]   ;;  %s836_s2 = inlined_call_operand.vmem [shape: f32[1,128], index: 2, kind: input, shape index: {}]   ;;  %s837_s3 = inlined_call_operand.hbm [shape: f32[128,128], index: 3, kind: input, shape index: {}]   ;;  %s838_s4 = inlined_call_operand.vmem [shape: f32[1,128], index: 4, kind: input, shape index: {}]   ;;  %s839_s5 = inlined_call_operand.hbm [shape: f32[128,128], index: 5, kind: input, shape index: {}]   ;;  %s840_s6 = inlined_call_operand.vmem [shape: f32[1,128], index: 6, kind: input, shape index: {}]   ;;  %s841_s7 = inlined_call_operand.hbm [shape: f32[8,128], index: 7, kind: output, shape index: {}]  }
   0x1   :  { %13 = vsyncpa [#allocation6], 0 }
   0x2   :  { %14 = vsyncpa [#allocation9], 0 }
   0x3   :  { %15 = vsyncpa [#allocation4], 0  ;;  %s685_s24 = smov [#allocation5]   ;;  %s567_s28 = scalar_lea.hbm %s835_s1, 512 }
   0x4   :  { %s31_s25 = sshll.u32 %s685_s24, 4  ;;  %p568_p0 = scmp.ne.s32.totalorder %s835_s1, %s567_s28  ;;  %s32_s25 = int_to_ptr.vmem [resolvable:$true] %s31_s25 }
   0x5   :  { %p571_p1 = scmp.lt.u32.totalorder %s567_s28, %s835_s1 }
   0x7   :  { %p573_p2 = pnand %p571_p1, %p568_p0 }
   0x9   :  { %576 = shalt.err (!%p573_p2)
}
   0xa   :  { %s577_s10 = scalar_lea.vmem %s32_s25, 512  ;;  %p582_p4 = scmp.lt.s32.totalorder %s32_s25, %s32_s25 }
   0xb   :  { %p578_p3 = scmp.ne.s32.totalorder %s32_s25, %s577_s10  ;;  %p583_p5 = scmp.lt.s32.totalorder %s577_s10, %s577_s10 }
   0xd   :  { %p584_p6 = por %p583_p5, %p582_p4 }
   0xf   :  { %p585_p7 = pnand %p584_p6, %p578_p3 }
  0x11   :  { %588 = shalt.err (!%p585_p7)
}
  0x12   :  { %s686_s11 = smov 128   ;;  %s687_s12 = smov 8  }
  0x13   :  { %37 = dma.hbm_to_vmem [thread:$0]  %s835_s1, 512, %s32_s25, [#allocation6], %s686_s11, %s686_s11, %s687_s12  }
  0x14   :  { %s688_s15 = smov [#allocation2]   ;;  %s689_s17 = smov [#allocation7]  }
  0x15   :  { %s22_s16 = sshll.u32 %s688_s15, 4  ;;  %s45_s18 = sshll.u32 %s689_s17, 4  ;;  %s23_s16 = int_to_ptr.vmem [resolvable:$true] %s22_s16  ;;  %s46_s18 = int_to_ptr.vmem [resolvable:$true] %s45_s18 }
  0x16   :  { %s589_s21 = scalar_lea.hbm %s834_s0, 128 }
  0x17   :  { %p590_p8 = scmp.ne.s32.totalorder %s834_s0, %s589_s21  ;;  %p593_p9 = scmp.lt.u32.totalorder %s589_s21, %s834_s0 }
  0x19   :  { %p595_p10 = pnand %p593_p9, %p590_p8 }
  0x1b   :  { %598 = shalt.err (!%p595_p10)
}
  0x1c   :  { %s599_s1 = scalar_lea.vmem %s23_s16, 128  ;;  %p604_p12 = scmp.lt.s32.totalorder %s23_s16, %s23_s16 }
  0x1d   :  { %p600_p11 = scmp.ne.s32.totalorder %s23_s16, %s599_s1  ;;  %p605_p13 = scmp.lt.s32.totalorder %s599_s1, %s599_s1 }
  0x1f   :  { %p606_p0 = por %p605_p13, %p604_p12 }
  0x21   :  { %p607_p1 = pnand %p606_p0, %p600_p11 }
  0x23   :  { %610 = shalt.err (!%p607_p1)
}
  0x24   :  { %25 = dma.hbm_to_vmem [thread:$0]  %s834_s0, 128, %s23_s16, [#allocation3]  }
  0x25   :  { %s611_s30 = scalar_lea.hbm %s837_s3, 2048 }
  0x26   :  { %p612_p2 = scmp.ne.s32.totalorder %s837_s3, %s611_s30  ;;  %p615_p3 = scmp.lt.u32.totalorder %s611_s30, %s837_s3 }
  0x28   :  { %p617_p4 = pnand %p615_p3, %p612_p2 }
  0x2a   :  { %620 = shalt.err (!%p617_p4)
}
  0x2b   :  { %s621_s14 = scalar_lea.vmem %s46_s18, 2048  ;;  %p626_p6 = scmp.lt.s32.totalorder %s46_s18, %s46_s18 }
  0x2c   :  { %p622_p5 = scmp.ne.s32.totalorder %s46_s18, %s621_s14  ;;  %p627_p7 = scmp.lt.s32.totalorder %s621_s14, %s621_s14 }
  0x2e   :  { %p628_p8 = por %p627_p7, %p626_p6 }
  0x30   :  { %p629_p9 = pnand %p628_p8, %p622_p5 }
  0x32   :  { %632 = shalt.err (!%p629_p9)
}
  0x33   :  { %51 = dma.hbm_to_vmem [thread:$0]  %s837_s3, 2048, %s46_s18, [#allocation6], %s686_s11, %s686_s11, %s687_s12  }
  0x34   :  { %s690_s16 = smov [#allocation8]   ;;  %s633_s21 = scalar_lea.hbm %s839_s5, 2048 }
  0x35   :  { %s59_s17 = sshll.u32 %s690_s16, 4  ;;  %p634_p10 = scmp.ne.s32.totalorder %s839_s5, %s633_s21  ;;  %s60_s17 = int_to_ptr.vmem [resolvable:$true] %s59_s17 }
  0x36   :  { %p637_p11 = scmp.lt.u32.totalorder %s633_s21, %s839_s5 }
  0x38   :  { %p639_p12 = pnand %p637_p11, %p634_p10 }
  0x3a   :  { %642 = shalt.err (!%p639_p12)
}
  0x3b   :  { %s643_s1 = scalar_lea.vmem %s60_s17, 2048  ;;  %p648_p0 = scmp.lt.s32.totalorder %s60_s17, %s60_s17 }
  0x3c   :  { %p644_p13 = scmp.ne.s32.totalorder %s60_s17, %s643_s1  ;;  %p649_p1 = scmp.lt.s32.totalorder %s643_s1, %s643_s1 }
  0x3e   :  { %p650_p2 = por %p649_p1, %p648_p0 }
  0x40   :  { %p651_p3 = pnand %p650_p2, %p644_p13 }
  0x42   :  { %654 = shalt.err (!%p651_p3)
}
  0x43   :  { %65 = dma.hbm_to_vmem [thread:$0]  %s839_s5, 2048, %s60_s17, [#allocation9], %s686_s11, %s686_s11, %s687_s12  }
  0x44   :  { %677 = dma.done.wait [#allocation3], 128  }
  0x45   :  { %678 = vsyncadd [#allocation3], 4294967168 }
  0x46   :  { %679 = dma.done.wait [#allocation6], 2560  }
  0x47   :  { %680 = vsyncadd [#allocation6], 4294964736 }
  0x48   :  { %681 = dma.done.wait [#allocation9], 2048  }
  0x49   :  { %682 = vsyncadd [#allocation9], 4294965248  ;;  %v691_v0 = vmov 0.0|0.0   ;;  %vm692_vm0 = vmmov 0   ;;  %v693_v1 = vmov 0.0   ;;  %v81_v2 = vld [vmem:[#allocation5] sm:$0xff] }
  0x4a   :  { %499 = vmatprep.subr.bf16.mxu0 %v691_v0  ;;  %426 = vmatprep.mubr.msk.f32.mxu0 %vm692_vm0, %v693_v1  ;;  %v82_v3 = vld [vmem:[#allocation5 + $0x8] sm:$0xff]  ;;  %v83_v4 = vld [vmem:[#allocation5 + $0x10] sm:$0xff]  ;;  %v84_v6 = vld [vmem:[#allocation5 + $0x18] sm:$0xff]  ;;  %vm92_vm1 = vcmask 261120   ;;  %s694_s28 = smov [#allocation10]  }
  0x4b   :  { %505 = vmatprep.subr.bf16.mxu1 %v691_v0  ;;  %461 = vmatprep.mubr.msk.f32.mxu1 %vm692_vm0, %v693_v1  ;;  %v500_v5 = vpack.c.bf16 %v82_v3, %v81_v2  ;;  %v167_v7 = vld [vmem:[#allocation7] sm:$0xff]  ;;  %v168_v8 = vld [vmem:[#allocation7 + $0x8] sm:$0xff]  ;;  %v169_v9 = vld [vmem:[#allocation7 + $0x10] sm:$0xff]  ;;  %v503_v11 = vpack.c.bf16 %v84_v6, %v83_v4  ;;  %s363_s29 = sshll.u32 %s694_s28, 4  ;;  %s364_s29 = int_to_ptr.vmem [resolvable:$true] %s363_s29 }
  0x4c   :  { %v170_v10 = vld [vmem:[#allocation7 + $0x18] sm:$0xff]  ;;  %v506_v12 = vpack.c.bf16 %v168_v8, %v167_v7  ;;  %v171_v14 = vld [vmem:[#allocation7 + $0x20] sm:$0xff]  ;;  %v172_v15 = vld [vmem:[#allocation7 + $0x28] sm:$0xff]  ;;  %s655_s30 = scalar_lea.vmem %s364_s29, 128  ;;  %p660_p5 = scmp.lt.s32.totalorder %s364_s29, %s364_s29 }
  0x4d   :  { %501 = vmatpush3.bf16.msra.mxu0 %v500_v5  ;;  %v509_v13 = vpack.c.bf16 %v170_v10, %v169_v9  ;;  %v80_v16 = vld [vmem:[#allocation2] sm:$0xff]  ;;  %v512_v17 = vpack.c.bf16 %v172_v15, %v171_v14  ;;  %v173_v18 = vld [vmem:[#allocation7 + $0x30] sm:$0xff]  ;;  %v175_v21 = vld [vmem:[#allocation7 + $0x40] sm:$0xff]  ;;  %p656_p4 = scmp.ne.s32.totalorder %s364_s29, %s655_s30  ;;  %p661_p6 = scmp.lt.s32.totalorder %s655_s30, %s655_s30 }
  0x4e   :  { %502 = vmatprep.subr.bf16.mxu0 %v691_v0  ;;  %507 = vmatpush3.bf16.msra.mxu1 %v506_v12  ;;  %v174_v19 = vld [vmem:[#allocation7 + $0x38] sm:$0xff]  ;;  %v176_v22 = vld [vmem:[#allocation7 + $0x48] sm:$0xff]  ;;  %v177_v24 = vld [vmem:[#allocation7 + $0x50] sm:$0xff] }
  0x4f   :  { %508 = vmatprep.subr.bf16.mxu1 %v691_v0  ;;  %v515_v20 = vpack.c.bf16 %v174_v19, %v173_v18  ;;  %v518_v23 = vpack.c.bf16 %v176_v22, %v175_v21  ;;  %v178_v25 = vld [vmem:[#allocation7 + $0x58] sm:$0xff]  ;;  %v179_v27 = vld [vmem:[#allocation7 + $0x60] sm:$0xff]  ;;  %v180_v28 = vld [vmem:[#allocation7 + $0x68] sm:$0xff]  ;;  %p662_p7 = por %p661_p6, %p660_p5 }
  0x50   :  { %v521_v26 = vpack.c.bf16 %v178_v25, %v177_v24  ;;  %v524_v29 = vpack.c.bf16 %v180_v28, %v179_v27  ;;  %v181_v30 = vld [vmem:[#allocation7 + $0x70] sm:$0xff]  ;;  %v182_v31 = vld [vmem:[#allocation7 + $0x78] sm:$0xff]  ;;  %v261_v33 = vld [vmem:[#allocation8] sm:$0xff] }
  0x51   :  { %504 = vmatpush3.bf16.msra.mxu0 %v503_v11  ;;  %v527_v32 = vpack.c.bf16 %v182_v31, %v181_v30  ;;  %v262_v34 = vld [vmem:[#allocation8 + $0x8] sm:$0xff]  ;;  %v263_v35 = vld [vmem:[#allocation8 + $0x10] sm:$0xff]  ;;  %v264_v37 = vld [vmem:[#allocation8 + $0x18] sm:$0xff]  ;;  %p663_p8 = pnand %p662_p7, %p656_p4 }
  0x52   :  { %529 = vmatprep.subr.bf16.mxu0 %v691_v0  ;;  %510 = vmatpush3.bf16.msra.mxu1 %v509_v13  ;;  %v530_v36 = vpack.c.bf16 %v262_v34, %v261_v33  ;;  %v533_v38 = vpack.c.bf16 %v264_v37, %v263_v35  ;;  %v265_v39 = vld [vmem:[#allocation8 + $0x20] sm:$0xff]  ;;  %v266_v40 = vld [vmem:[#allocation8 + $0x28] sm:$0xff]  ;;  %v267_v42 = vld [vmem:[#allocation8 + $0x30] sm:$0xff] }
  0x53   :  { %511 = vmatprep.subr.bf16.mxu1 %v691_v0  ;;  %v536_v41 = vpack.c.bf16 %v266_v40, %v265_v39  ;;  %v268_v43 = vld [vmem:[#allocation8 + $0x38] sm:$0xff]  ;;  %v269_v45 = vld [vmem:[#allocation8 + $0x40] sm:$0xff]  ;;  %v270_v46 = vld [vmem:[#allocation8 + $0x48] sm:$0xff] }
  0x54   :  { %427 = vmatmul.mubr.msk.f32.vlgmr.msra.gmra.mrb[0].mxu0 %vm92_vm1, %v80_v16  ;;  %v539_v44 = vpack.c.bf16 %v268_v43, %v267_v42  ;;  %v542_v47 = vpack.c.bf16 %v270_v46, %v269_v45  ;;  %v374_v48 = vld [vmem:[%s836_s2] ss:$0 sm:$0xff]  ;;  %v271_v53 = vld [vmem:[#allocation8 + $0x50] sm:$0xff]  ;;  %v273_v56 = vld [vmem:[#allocation8 + $0x60] sm:$0xff] }
  0x55   :  { %496 = vmatprep.mubr.msk.f32.mxu0 %vm692_vm0, %v693_v1  ;;  %531 = vmatpush3.bf16.msra.mxu0 %v530_v36  ;;  %v272_v54 = vld [vmem:[#allocation8 + $0x58] sm:$0xff]  ;;  %v274_v57 = vld [vmem:[#allocation8 + $0x68] sm:$0xff]  ;;  %v275_v59 = vld [vmem:[#allocation8 + $0x70] sm:$0xff] }
  0x56   :  { %513 = vmatpush3.bf16.msra.mxu1 %v512_v17  ;;  %532 = vmatprep.subr.bf16.mxu0 %v691_v0  ;;  %v545_v55 = vpack.c.bf16 %v272_v54, %v271_v53  ;;  %v548_v58 = vpack.c.bf16 %v274_v57, %v273_v56  ;;  %v276_v60 = vld [vmem:[#allocation8 + $0x78] sm:$0xff] }
  0x57   :  { %514 = vmatprep.subr.bf16.mxu1 %v691_v0  ;;  %v551_v61 = vpack.c.bf16 %v276_v60, %v275_v59  ;;  %v376_v62 = vld [vmem:[%s838_s4] ss:$0 sm:$0xff] }
  0x58   :  { %v377_v4 = vld [vmem:[%s840_s6] ss:$0 sm:$0xff] }
  0x59   :  { %534 = vmatpush3.bf16.msra.mxu0 %v533_v38 }
  0x5a   :  { %516 = vmatpush3.bf16.msra.mxu1 %v515_v20  ;;  %535 = vmatprep.subr.bf16.mxu0 %v691_v0 }
  0x5b   :  { %517 = vmatprep.subr.bf16.mxu1 %v691_v0 }
  0x5d   :  { %537 = vmatpush3.bf16.msra.mxu0 %v536_v41 }
  0x5e   :  { %519 = vmatpush3.bf16.msra.mxu1 %v518_v23  ;;  %538 = vmatprep.subr.bf16.mxu0 %v691_v0 }
  0x5f   :  { %520 = vmatprep.subr.bf16.mxu1 %v691_v0 }
  0x61   :  { %540 = vmatpush3.bf16.msra.mxu0 %v539_v44 }
  0x62   :  { %522 = vmatpush3.bf16.msra.mxu1 %v521_v26  ;;  %541 = vmatprep.subr.bf16.mxu0 %v691_v0 }
  0x63   :  { %523 = vmatprep.subr.bf16.mxu1 %v691_v0 }
  0x65   :  { %543 = vmatpush3.bf16.msra.mxu0 %v542_v47 }
  0x66   :  { %525 = vmatpush3.bf16.msra.mxu1 %v524_v29  ;;  %544 = vmatprep.subr.bf16.mxu0 %v691_v0 }
  0x67   :  { %526 = vmatprep.subr.bf16.mxu1 %v691_v0 }
  0x69   :  { %546 = vmatpush3.bf16.msra.mxu0 %v545_v55 }
  0x6a   :  { %528 = vmatpush3.bf16.msra.mxu1 %v527_v32  ;;  %547 = vmatprep.subr.bf16.mxu0 %v691_v0 }
  0x6d   :  { %549 = vmatpush3.bf16.msra.mxu0 %v548_v58 }
  0x6e   :  { %550 = vmatprep.subr.bf16.mxu0 %v691_v0 }
  0x71   :  { %552 = vmatpush3.bf16.msra.mxu0 %v551_v61 }
 0x127   :  { %v162_v49 = vpop.f32.mrb[0].mxu0 }
 0x128   :  { %v163_v50 = vadd.f32 %v374_v48, %v162_v49  ;;  %v428_v51 = vpop.f32.mrb[1].mxu0 }
 0x12a   :  { %563 = vtanh.f32 %v163_v50 }
 0x134   :  { %v564_v52 = vpop.eup %563 }
 0x135   :  { %462 = vmatmul.mubr.f32.vlgmr.msra.gmra.mrb[0].mxu1 %v564_v52 }
 0x208   :  { %v256_v63 = vpop.f32.mrb[0].mxu1 }
 0x209   :  { %v257_v1 = vadd.f32 %v376_v62, %v256_v63  ;;  %v463_v2 = vpop.f32.mrb[1].mxu1 }
 0x20b   :  { %565 = vtanh.f32 %v257_v1 }
 0x215   :  { %v566_v3 = vpop.eup %565 }
 0x216   :  { %497 = vmatmul.mubr.f32.vlgmr.msra.gmra.mrb[2].mxu0 %v566_v3 }
 0x2e9   :  { %v350_v5 = vpop.f32.mrb[2].mxu0 }
 0x2ea   :  { %v351_v6 = vadd.f32 %v377_v4, %v350_v5  ;;  %v498_v0 = vpop.f32.mrb[3].mxu0 }
 0x2ec   :  { %v378_v7 = vclamps-f32 %v351_v6, 1.0 }
 0x2ee   :  { %356 = vst [vmem:[#allocation10] sm:$0xff] %v378_v7 }
 0x2ef   :  { %666 = shalt.err (!%p663_p8)
}
 0x2f0   :  { %s667_s9 = scalar_lea.hbm %s841_s7, 128 }
 0x2f1   :  { %p668_p9 = scmp.ne.s32.totalorder %s841_s7, %s667_s9  ;;  %p671_p10 = scmp.lt.u32.totalorder %s667_s9, %s841_s7 }
 0x2f3   :  { %p673_p11 = pnand %p671_p10, %p668_p9 }
 0x2f5   :  { %676 = shalt.err (!%p673_p11)
}
 0x2f6   :  { %366 = dma.vmem_to_hbm [thread:$0]  %s364_s29, 128, %s841_s7, [#allocation4]  }
 0x2f7   :  { %683 = dma.done.wait [#allocation4], 128  }
 0x2f8   :  { %684 = vsyncadd [#allocation4], 4294967168 }
 0x2f9   :  { %370 = vsyncpa [#allocation3], 1 }
 0x2fa   :  { %371 = vsyncpa [#allocation6], 1 }
 0x2fb   :  { %372 = vsyncpa [#allocation9], 1 }
 0x2fc   :  { %373 = vsyncpa [#allocation4], 1 }

</bundles_post_ra>
